<compile_context>
chip_gen: v5e
topology: v5e:2x2
jax: 0.10.0
libtpu: 0.0.40
codegen_flags: <defaults>
</compile_context>

<pallas_src>
import numpy as np

import jax
import jax.numpy as jnp
from jax.experimental import pallas as pl
from jax.experimental.pallas import tpu as pltpu

HIDDEN = 64                       # net_arch=[64, 64]
LANE = 128
K_ACTION_NET_GAIN = 0.01
K_BACKBONE_GAIN = float(np.sqrt(2.0))


def _round_up(x, m):
    return ((x + m - 1) // m) * m


def _default_compute_dtype():
    """bf16 operands (f32 accumulate) on v6e/v7x; f32 on v5e (no bf16 VPU/EUP)."""
    try:
        kind = jax.devices()[0].device_kind.lower()
    except Exception:
        return jnp.float32
    if "v5 lite" in kind or "v5e" in kind or "v5lite" in kind:
        return jnp.float32
    return jnp.bfloat16


def _policy_kernel(x_ref, w1_ref, b1_ref, w2_ref, b2_ref, w3_ref, b3_ref,
                   mean_ref):
    # backbone: Linear -> Tanh -> Linear -> Tanh ; mean_net: Linear
    # Operands may be bf16 (MXU), accumulation/bias/tanh are f32.
    wdt = w1_ref.dtype
    x = x_ref[...]
    h1 = jnp.tanh(
        jnp.dot(x, w1_ref[...], preferred_element_type=jnp.float32) + b1_ref[...]
    )
    h2 = jnp.tanh(
        jnp.dot(h1.astype(wdt), w2_ref[...], preferred_element_type=jnp.float32)
        + b2_ref[...]
    )
    means = (
        jnp.dot(h2.astype(wdt), w3_ref[...], preferred_element_type=jnp.float32)
        + b3_ref[...]
    )
    mean_ref[...] = means               # lane-dense [TILE_B, 128] slab store


def mlp_gaussian_policy_forward(states, params, *, tile_b=512, compute_dtype=None):
    """states: [B, state_dim] float32. Returns (means [B, A], cov [A, A])."""
    w1, b1, w2, b2, w3, b3, log_std = params
    B, S = states.shape
    H = w1.shape[1]
    A = w3.shape[1]

    if compute_dtype is None:
        compute_dtype = _default_compute_dtype()

    # Lane-pad every matmul/output dim to 128 (zeros propagate exactly:
    # tanh(0)=0 and zero weight rows/cols contribute nothing).
    s_pad = _round_up(S, LANE)
    h_pad = _round_up(H, LANE)
    a_pad = _round_up(A, LANE)

    # Batch tiling (sublane multiple of 8), pad B up to a multiple of TILE_B.
    tile_b = _round_up(max(8, min(tile_b, _round_up(B, 8))), 8)
    b_pad = _round_up(B, tile_b)
    grid = (b_pad // tile_b,)

    # One-time wrapper-side padding + cast.
    x_p = jnp.zeros((b_pad, s_pad), compute_dtype).at[:B, :S].set(
        states.astype(compute_dtype))
    w1_p = jnp.zeros((s_pad, h_pad), compute_dtype).at[:S, :H].set(
        w1.astype(compute_dtype))
    w2_p = jnp.zeros((h_pad, h_pad), compute_dtype).at[:H, :H].set(
        w2.astype(compute_dtype))
    w3_p = jnp.zeros((h_pad, a_pad), compute_dtype).at[:H, :A].set(
        w3.astype(compute_dtype))
    b1_p = jnp.zeros((1, h_pad), jnp.float32).at[:, :H].set(b1.astype(jnp.float32))
    b2_p = jnp.zeros((1, h_pad), jnp.float32).at[:, :H].set(b2.astype(jnp.float32))
    b3_p = jnp.zeros((1, a_pad), jnp.float32).at[:, :A].set(b3.astype(jnp.float32))

    itemsize = np.dtype(compute_dtype).itemsize
    cost = pl.CostEstimate(
        flops=2 * b_pad * (s_pad * h_pad + h_pad * h_pad + h_pad * a_pad),
        transcendentals=2 * b_pad * h_pad,
        bytes_accessed=(b_pad * s_pad * itemsize            # states in
                        + b_pad * a_pad * 4                  # means out (f32)
                        + (s_pad * h_pad + h_pad * h_pad + h_pad * a_pad) * itemsize
                        + 2 * h_pad * 4 + a_pad * 4),        # biases
    )

    wconst = lambda shape: pl.BlockSpec(shape, lambda i: (0, 0))

    means_p = pl.pallas_call(
        _policy_kernel,
        out_shape=jax.ShapeDtypeStruct((b_pad, a_pad), jnp.float32),
        grid=grid,
        in_specs=[
            pl.BlockSpec((tile_b, s_pad), lambda i: (i, 0)),   # batch-tiled states
            wconst((s_pad, h_pad)), wconst((1, h_pad)),        # resident W1, b1
            wconst((h_pad, h_pad)), wconst((1, h_pad)),        # resident W2, b2
            wconst((h_pad, a_pad)), wconst((1, a_pad)),        # resident W3, b3
        ],
        out_specs=pl.BlockSpec((tile_b, a_pad), lambda i: (i, 0)),
        compiler_params=pltpu.CompilerParams(
            dimension_semantics=("parallel",),                 # megacore sharding
            vmem_limit_bytes=48 << 20,                         # safe on v7x (64 MiB)
        ),
        cost_estimate=cost,
    )(x_p, w1_p, b1_p, w2_p, b2_p, w3_p, b3_p)

    means = means_p[:B, :A]

    # shared_cov_matrix = diag_embed(exp(log_std)) — batch independent, tiny,
    # computed once outside the kernel.
    cov = jnp.diag(jnp.exp(log_std.reshape(-1)))
    return means, cov


def init_params(state_dim, action_dim, log_std_init=0.0, seed=0):
    """Deterministic orthogonal init matching the PyTorch module's __init__."""
    key = jax.random.PRNGKey(seed)
    k1, k2, k3 = jax.random.split(key, 3)
    ortho = jax.nn.initializers.orthogonal

    # PyTorch Linear weight is (out, in); we store the transpose (in, out).
    w1 = ortho(scale=K_BACKBONE_GAIN)(k1, (state_dim, HIDDEN), jnp.float32)
    w2 = ortho(scale=K_BACKBONE_GAIN)(k2, (HIDDEN, HIDDEN), jnp.float32)
    w3 = ortho(scale=K_ACTION_NET_GAIN)(k3, (HIDDEN, action_dim), jnp.float32)
    b1 = jnp.zeros((1, HIDDEN), jnp.float32)
    b2 = jnp.zeros((1, HIDDEN), jnp.float32)
    b3 = jnp.zeros((1, action_dim), jnp.float32)
    log_std = jnp.full((1, action_dim), log_std_init, jnp.float32)
    return (w1, b1, w2, b2, w3, b3, log_std)


def reference_forward(states, params):
    w1, b1, w2, b2, w3, b3, log_std = params
    h1 = jnp.tanh(states @ w1 + b1)
    h2 = jnp.tanh(h1 @ w2 + b2)
    means = h2 @ w3 + b3
    cov = jnp.diag(jnp.exp(log_std[0]))
    return means, cov


if __name__ == "__main__":
    batch, state_dim, action_dim = 40, 16, 4   # exercises batch padding + 3-step grid

    key = jax.random.PRNGKey(0)
    states = jax.random.normal(key, (batch, state_dim), jnp.float32)
    params = init_params(state_dim, action_dim, log_std_init=0.0, seed=0)

    compute_dtype = _default_compute_dtype()
    means, cov = mlp_gaussian_policy_forward(
        states, params, tile_b=16, compute_dtype=compute_dtype)
    jax.block_until_ready((means, cov))

    ref_means, ref_cov = reference_forward(states, params)
    if compute_dtype == jnp.bfloat16:
        rtol, atol = 2e-2, 2e-3          # bf16 operands, f32 accumulation
    else:
        rtol, atol = 1e-5, 1e-5          # pure f32 path (v5e)
    np.testing.assert_allclose(np.asarray(means), np.asarray(ref_means),
                               rtol=rtol, atol=atol)
    np.testing.assert_allclose(np.asarray(cov), np.asarray(ref_cov),
                               rtol=1e-6, atol=1e-6)

    # TODO(synk): the MultivariateNormal Distribution object itself (sampling /
    # log_prob) has no Pallas equivalent; the kernel produces its parameters.
    print("KERNEL_OK")
</pallas_src>

<mosaic_0001>
module attributes {stable_mosaic.version = 11 : i64} {
  func.func @_policy_kernel(%arg0: i32, %arg1: memref<16x128xbf16, #tpu.memory_space<vmem>>, %arg2: memref<128x128xbf16, #tpu.memory_space<vmem>>, %arg3: memref<1x128xf32, #tpu.memory_space<vmem>>, %arg4: memref<128x128xbf16, #tpu.memory_space<vmem>>, %arg5: memref<1x128xf32, #tpu.memory_space<vmem>>, %arg6: memref<128x128xbf16, #tpu.memory_space<vmem>>, %arg7: memref<1x128xf32, #tpu.memory_space<vmem>>, %arg8: memref<16x128xf32, #tpu.memory_space<vmem>>) attributes {dimension_semantics = [#tpu.dimension_semantics<parallel>], iteration_bounds = array<i64: 3>, scalar_prefetch = 0 : i64, scratch_operands = 0 : i64, tpu.core_type = #tpu.core_type<tc>, window_params = [{transform_indices = @transform_0, window_bounds = array<i64: 16, 128>}, {pipeline_mode = #tpu.pipeline_mode<synchronous>, transform_indices = @transform_1, window_bounds = array<i64: 128, 128>}, {pipeline_mode = #tpu.pipeline_mode<synchronous>, transform_indices = @transform_2, window_bounds = array<i64: 1, 128>}, {pipeline_mode = #tpu.pipeline_mode<synchronous>, transform_indices = @transform_3, window_bounds = array<i64: 128, 128>}, {pipeline_mode = #tpu.pipeline_mode<synchronous>, transform_indices = @transform_4, window_bounds = array<i64: 1, 128>}, {pipeline_mode = #tpu.pipeline_mode<synchronous>, transform_indices = @transform_5, window_bounds = array<i64: 128, 128>}, {pipeline_mode = #tpu.pipeline_mode<synchronous>, transform_indices = @transform_6, window_bounds = array<i64: 1, 128>}, {transform_indices = @transform_7, window_bounds = array<i64: 16, 128>}]} {
    %c0 = arith.constant 0 : index
    %c0_0 = arith.constant 0 : index
    %0 = vector.load %arg1[%c0, %c0_0] : memref<16x128xbf16, #tpu.memory_space<vmem>>, vector<16x128xbf16>
    %c0_1 = arith.constant 0 : index
    %c0_2 = arith.constant 0 : index
    %1 = vector.load %arg2[%c0_1, %c0_2] : memref<128x128xbf16, #tpu.memory_space<vmem>>, vector<128x128xbf16>
    %cst = arith.constant dense<0.000000e+00> : vector<16x128xf32>
    %2 = tpu.matmul %0, %1, %cst {dimension_numbers = #tpu.dot_dimension_numbers<[1], [0], [0], [1], [0, 0, 1, 1], [], []>} : vector<16x128xbf16>, vector<128x128xbf16>, vector<16x128xf32> -> vector<16x128xf32>
    %c0_3 = arith.constant 0 : index
    %c0_4 = arith.constant 0 : index
    %3 = vector.load %arg3[%c0_3, %c0_4] : memref<1x128xf32, #tpu.memory_space<vmem>>, vector<1x128xf32>
    %4 = vector.broadcast %3 : vector<1x128xf32> to vector<16x128xf32>
    %5 = arith.addf %2, %4 : vector<16x128xf32>
    %6 = math.tanh %5 : vector<16x128xf32>
    %7 = arith.truncf %6 : vector<16x128xf32> to vector<16x128xbf16>
    %c0_5 = arith.constant 0 : index
    %c0_6 = arith.constant 0 : index
    %8 = vector.load %arg4[%c0_5, %c0_6] : memref<128x128xbf16, #tpu.memory_space<vmem>>, vector<128x128xbf16>
    %cst_7 = arith.constant dense<0.000000e+00> : vector<16x128xf32>
    %9 = tpu.matmul %7, %8, %cst_7 {dimension_numbers = #tpu.dot_dimension_numbers<[1], [0], [0], [1], [0, 0, 1, 1], [], []>} : vector<16x128xbf16>, vector<128x128xbf16>, vector<16x128xf32> -> vector<16x128xf32>
    %c0_8 = arith.constant 0 : index
    %c0_9 = arith.constant 0 : index
    %10 = vector.load %arg5[%c0_8, %c0_9] : memref<1x128xf32, #tpu.memory_space<vmem>>, vector<1x128xf32>
    %11 = vector.broadcast %10 : vector<1x128xf32> to vector<16x128xf32>
    %12 = arith.addf %9, %11 : vector<16x128xf32>
    %13 = math.tanh %12 : vector<16x128xf32>
    %14 = arith.truncf %13 : vector<16x128xf32> to vector<16x128xbf16>
    %c0_10 = arith.constant 0 : index
    %c0_11 = arith.constant 0 : index
    %15 = vector.load %arg6[%c0_10, %c0_11] : memref<128x128xbf16, #tpu.memory_space<vmem>>, vector<128x128xbf16>
    %cst_12 = arith.constant dense<0.000000e+00> : vector<16x128xf32>
    %16 = tpu.matmul %14, %15, %cst_12 {dimension_numbers = #tpu.dot_dimension_numbers<[1], [0], [0], [1], [0, 0, 1, 1], [], []>} : vector<16x128xbf16>, vector<128x128xbf16>, vector<16x128xf32> -> vector<16x128xf32>
    %c0_13 = arith.constant 0 : index
    %c0_14 = arith.constant 0 : index
    %17 = vector.load %arg7[%c0_13, %c0_14] : memref<1x128xf32, #tpu.memory_space<vmem>>, vector<1x128xf32>
    %18 = vector.broadcast %17 : vector<1x128xf32> to vector<16x128xf32>
    %19 = arith.addf %16, %18 : vector<16x128xf32>
    %c0_15 = arith.constant 0 : index
    %c0_16 = arith.constant 0 : index
    %20 = vector.load %arg8[%c0_15, %c0_16] : memref<16x128xf32, #tpu.memory_space<vmem>>, vector<16x128xf32>
    tpu.vector_store %arg8[%c0_15, %c0_16], %19 {strides = array<i32>} : memref<16x128xf32, #tpu.memory_space<vmem>>, vector<16x128xf32>,
    return
  }
  func.func @transform_0(%arg0: i32) -> (i32, i32) {
    %c0_i32 = arith.constant 0 : i32
    %c0_i32_0 = arith.constant 0 : i32
    return %arg0, %c0_i32 : i32, i32
  }
  func.func @transform_1(%arg0: i32) -> (i32, i32) {
    %c0_i32 = arith.constant 0 : i32
    %c0_i32_0 = arith.constant 0 : i32
    %c0_i32_1 = arith.constant 0 : i32
    return %c0_i32, %c0_i32_0 : i32, i32
  }
  func.func @transform_2(%arg0: i32) -> (i32, i32) {
    %c0_i32 = arith.constant 0 : i32
    %c0_i32_0 = arith.constant 0 : i32
    %c0_i32_1 = arith.constant 0 : i32
    return %c0_i32, %c0_i32_0 : i32, i32
  }
  func.func @transform_3(%arg0: i32) -> (i32, i32) {
    %c0_i32 = arith.constant 0 : i32
    %c0_i32_0 = arith.constant 0 : i32
    %c0_i32_1 = arith.constant 0 : i32
    return %c0_i32, %c0_i32_0 : i32, i32
  }
  func.func @transform_4(%arg0: i32) -> (i32, i32) {
    %c0_i32 = arith.constant 0 : i32
    %c0_i32_0 = arith.constant 0 : i32
    %c0_i32_1 = arith.constant 0 : i32
    return %c0_i32, %c0_i32_0 : i32, i32
  }
  func.func @transform_5(%arg0: i32) -> (i32, i32) {
    %c0_i32 = arith.constant 0 : i32
    %c0_i32_0 = arith.constant 0 : i32
    %c0_i32_1 = arith.constant 0 : i32
    return %c0_i32, %c0_i32_0 : i32, i32
  }
  func.func @transform_6(%arg0: i32) -> (i32, i32) {
    %c0_i32 = arith.constant 0 : i32
    %c0_i32_0 = arith.constant 0 : i32
    %c0_i32_1 = arith.constant 0 : i32
    return %c0_i32, %c0_i32_0 : i32, i32
  }
  func.func @transform_7(%arg0: i32) -> (i32, i32) {
    %c0_i32 = arith.constant 0 : i32
    %c0_i32_0 = arith.constant 0 : i32
    return %arg0, %c0_i32 : i32, i32
  }
}

</mosaic_0001>

<bundles_post_ra>
// kernel: tpu_custom_call.1
= control target key start
LH: loop header
LB: loop body
LE: loop exit
PB: predicated region body
PF: predicated region fallthrough
CT: control target
= control target key end

     0   :  { %s1391_s0 = inlined_call_operand.hbm [shape: bf16[48,128], index: 0, kind: input, shape index: {}]   ;;  %s1392_s1 = inlined_call_operand.hbm [shape: bf16[128,128], index: 1, kind: input, shape index: {}]   ;;  %s1393_s2 = inlined_call_operand.vmem [shape: f32[1,128], index: 2, kind: input, shape index: {}]   ;;  %s1394_s3 = inlined_call_operand.hbm [shape: bf16[128,128], index: 3, kind: input, shape index: {}]   ;;  %s1395_s4 = inlined_call_operand.vmem [shape: f32[1,128], index: 4, kind: input, shape index: {}]   ;;  %s1396_s5 = inlined_call_operand.hbm [shape: bf16[128,128], index: 5, kind: input, shape index: {}]   ;;  %s1397_s6 = inlined_call_operand.vmem [shape: f32[1,128], index: 6, kind: input, shape index: {}]   ;;  %s1398_s7 = inlined_call_operand.hbm [shape: f32[48,128], index: 7, kind: output, shape index: {}]  }
   0x1   :  { %1401 = sst [smem:[#allocation15_spill]] %s1392_s1 }
   0x2   :  { %12 = vsyncpa [#allocation3], 0 }
   0x3   :  { %14 = vsyncpa [#allocation3 + $0x1], 0 }
   0x4   :  { %15 = vsyncpa [#allocation6], 0 }
   0x5   :  { %16 = vsyncpa [#allocation9], 0 }
   0x6   :  { %17 = vsyncpa [#allocation4], 0 }
   0x7   :  { %19 = vsyncpa [#allocation4 + $0x1], 0  ;;  %s1213_s24 = smov 0   ;;  %s1215_s25 = smov 0  }
   0x8   :  { %s1217_s26 = smov 0   ;;  %s1219_s27 = smov 0  }
   0x9 LB: > { %s1234_s28 = sadd.s32 4294967295, %s1164_s27   ;;  %s731_s29 = sadd.s32 4294967294, %s1164_s27   ;;  %s1164_s27 = sphi %s1219_s27, %s1414_s27   ;;  %s1160_s26 = sphi %s1217_s26, %s1413_s26   ;;  %s1156_s25 = sphi %s1215_s25, %s1412_s25   ;;  %s1152_s24 = sphi %s1213_s24, %s1411_s24  }
   0xa   : > { %p45_p0 = scmp.ne.s32.totalorder %s1156_s25, %s1152_s24  ;;  %p46_p1 = scmp.eq.s32.totalorder %s1234_s28, 0 }
   0xb   : > { %p195_p2 = scmp.eq.s32.totalorder %s1234_s28, 2  ;;  %p201_p3 = scmp.eq.s32.totalorder %s731_s29, 2 }
   0xc   : > { %p1243_p4 = por %p46_p1, %p45_p0  ;;  %p732_p5 = scmp.ge.s32.totalorder %s1164_s27, 1 }
   0xd   : > { %p1248_p6 = por %p201_p3, %p45_p0  ;;  %p208_p7 = scmp.lt.s32.totalorder %s1164_s27, 4 }
   0xe   : > { %s1404_s1 = sld [smem:[#allocation15_spill]]  ;;  %s1166_s13 = smov [#allocation5]  }
   0xf   : > { %p1256_p8 = pnand %p732_p5, %p208_p7  ;;  %s221_s14 = sshll.u32 %s1166_s13, 4  ;;  %s222_s14 = int_to_ptr.vmem [resolvable:$true] %s221_s14 }
  0x10   : > { %s236_s18 = sshll.u32 %s1394_s3, 4  ;;  %s1399_s19 = smov 64   ;;  %s237_s18 = int_to_ptr.hbm [resolvable:$true] %s236_s18 }
  0x11   : > { %p894_p9 = pneg %p1256_p8  ;;  %s1400_s20 = smov 4  }
  0x12   : > { %s1169_s21 = smov [#allocation7]   ;;  %s253_s9 = sshll.u32 %s1396_s5, 4  ;;  %s254_s9 = int_to_ptr.hbm [resolvable:$true] %s253_s9 }
  0x13   : > { %p1264_p10 = pnand %p894_p9, %p46_p1  ;;  %s238_s22 = sshll.u32 %s1169_s21, 4  ;;  %s239_s22 = int_to_ptr.vmem [resolvable:$true] %s238_s22 }
  0x14   : > { %s219_s11 = sshll.u32 %s1404_s1, 4  ;;  %s1170_s10 = smov [#allocation8]   ;;  %s220_s11 = int_to_ptr.hbm [resolvable:$true] %s219_s11 }
  0x15   : > { %897 = dma.hbm_to_vmem [thread:$0]  (!%p1264_p10), %s220_s11, 1024, %s222_s14, [#allocation6], %s1399_s19, %s1399_s19, %s1400_s20  }
  0x16   : > { %900 = dma.hbm_to_vmem [thread:$0]  (!%p1264_p10), %s237_s18, 1024, %s239_s22, [#allocation6], %s1399_s19, %s1399_s19, %s1400_s20  }
  0x17   : > { %s255_s11 = sshll.u32 %s1170_s10, 4  ;;  %s1285_s13 = sadd.s32 1, %s1164_s27   ;;  %s256_s11 = int_to_ptr.vmem [resolvable:$true] %s255_s11 }
  0x18   : > { %903 = dma.hbm_to_vmem [thread:$0]  (!%p1264_p10), %s254_s9, 1024, %s256_s11, [#allocation9], %s1399_s19, %s1399_s19, %s1400_s20  }
  0x19   : > { %s29_s14 = ssub.s32 %s1164_s27, %s1285_s13  ;;  %s32_s16 = sadd.s32 1, %s1160_s26 }
  0x1a   : > { %p30_p11 = scmp.eq.s32.totalorder %s29_s14, 0  ;;  %p39_p12 = scmp.ne.s32.totalorder %s1160_s26, %s1156_s25 }
  0x1b   : > { %p40_p13 = scmp.eq.s32.totalorder %s1164_s27, 0  ;;  %p915_p3 = scmp.lt.s32.totalorder %s1164_s27, 3 }
  0x1c   : > { %s1299_s17 = scalar_select %p30_p11, %s1160_s26, %s32_s16  }
  0x1d   : > { %p1303_p0 = por %p195_p2, %p39_p12  ;;  %s272_s21 = sand.u32 1, %s1160_s26  }
  0x1e   : > { %s851_s15 = sshll.u32 %s1164_s27, 3  ;;  %p41_p5 = por %p40_p13, %p39_p12 }
  0x1f   : > { %s737_s22 = sshll.u32 %s272_s21, 3  ;;  %s281_s9 = scalar_lea.hbm %s1391_s0, %s851_s15 }
  0x20   : > { %s282_s10 = sshll.u32 %s281_s9, 4  ;;  %s276_s11 = scalar_lea.vmem [#allocation2], %s737_s22  ;;  %s283_s10 = int_to_ptr.hbm [resolvable:$true] %s282_s10 }
  0x21   : > { %s284_s14 = sshll.u32 %s276_s11, 4  ;;  %p1313_p7 = pnand %p915_p3, %p41_p5  ;;  %s285_s14 = int_to_ptr.vmem [resolvable:$true] %s284_s14 }
  0x22   : > { %s273_s19 = scalar_lea.sflag [#allocation3], %s272_s21  ;;  %s1060_s20 = sshra.s32 %s283_s10, 4  ;;  %s1061_s20 = int_to_ptr.hbm [resolvable:$true] %s1060_s20 }
  0x23   : > { %s1062_s1 = scalar_lea.hbm %s1061_s20, 8  ;;  %p1064_p9 = pneg %p1313_p7 }
  0x24   : > { %p1063_p2 = scmp.ne.s32.totalorder %s1061_s20, %s1062_s1  ;;  %s1067_s22 = scalar_lea.hbm %s1391_s0, 24 }
  0x25   : > { %p1068_p12 = scmp.lt.s32.totalorder %s1061_s20, %s1391_s0  ;;  %p1069_p13 = scmp.lt.s32.totalorder %s1067_s22, %s1062_s1 }
  0x26   : > { %p1065_p10 = pnand %p1064_p9, %p1063_p2 }
  0x27   : > { %p1070_p3 = por %p1069_p13, %p1068_p12 }
  0x28   : > { %p1066_p11 = pneg %p1065_p10 }
  0x2a   : > { %p1071_p5 = pnand %p1070_p3, %p1066_p11 }
  0x2c   : > { %1074 = shalt.err (!%p1071_p5)
}
  0x2d   : > { %s1409_s21 = smov 4   ;;  %s1410_s11 = smov 64  }
  0x2e   : > { %907 = dma.hbm_to_vmem [thread:$0]  (!%p1313_p7), %s283_s10, 128, %s285_s14, %s273_s19, %s1410_s11, %s1410_s11, %s1409_s21  }
  0x2f   : > { %296 = sbr.rel (%p1256_p8) target bundleno = 525 (0x20d), region = 48  ;;  %s1333_s15 = sand.u32 (!%p1256_p8), 1, %s1156_s25  }
  0x30   : > { %s741_s20 = sshll.u32 (!%p1256_p8), %s1333_s15, 3  ;;  %s299_s1 = scalar_lea.sflag (!%p1256_p8), [#allocation3], %s1333_s15 }
  0x31   : > { %s302_s23 = scalar_lea.vmem (!%p1256_p8), [#allocation2], %s741_s20 }
  0x34   : > { %1135 = dma.done.wait (%p1243_p4), %s299_s1, 128  }
  0x35   : > { %1137 = vsyncadd (%p1243_p4), %s299_s1, 4294967168 }
  0x36   : > { %1139 = dma.done.wait (%p46_p1), [#allocation6], 2048  }
  0x37   : > { %1141 = vsyncadd (%p46_p1), [#allocation6], 4294965248 }
  0x38   : > { %1143 = dma.done.wait (%p46_p1), [#allocation9], 1024  }
  0x39   : > { %1145 = vsyncadd (%p46_p1), [#allocation9], 4294966272  ;;  %v860_v0 = vld [vmem:[#allocation5 + $0x38] sm:$0xff]  ;;  %v859_v1 = vld [vmem:[#allocation5 + $0x30] sm:$0xff]  ;;  %s745_s14 = sshll.u32 %s1333_s15, 4  ;;  %s877_s29 = sshll.u32 %s1234_s28, 4 }
  0x3a   : > { %427 = vmatpush.bf16.msra.mxu0 %v860_v0  ;;  %v868_v2 = vld [vmem:[#allocation7 + $0x38] sm:$0xff]  ;;  %v867_v3 = vld [vmem:[#allocation7 + $0x30] sm:$0xff]  ;;  %v858_v4 = vld [vmem:[#allocation5 + $0x28] sm:$0xff]  ;;  %s625_s11 = scalar_lea.hbm %s1398_s7, %s877_s29  ;;  %s348_s20 = scalar_lea.vmem [#allocation10], %s745_s14 }
  0x3b   : > { %512 = vmatpush.bf16.msra.mxu1 %v868_v2  ;;  %v866_v5 = vld [vmem:[#allocation7 + $0x28] sm:$0xff]  ;;  %v857_v6 = vld [vmem:[#allocation5 + $0x20] sm:$0xff]  ;;  %v856_v7 = vld [vmem:[#allocation5 + $0x18] sm:$0xff]  ;;  %s626_s1 = sshll.u32 %s348_s20, 4  ;;  %s614_s30 = scalar_lea.sflag [#allocation4], %s1333_s15  ;;  %s627_s1 = int_to_ptr.vmem [resolvable:$true] %s626_s1 }
  0x3c   : > { %v855_v8 = vld [vmem:[#allocation5 + $0x10] sm:$0xff]  ;;  %v854_v9 = vld [vmem:[#allocation5 + $0x8] sm:$0xff]  ;;  %v853_v10 = vld [vmem:[#allocation5] sm:$0xff]  ;;  %s1110_s14 = scalar_lea.hbm %s1398_s7, 48 }
  0x3d   : > { %v852_v11 = vld [vmem:[%s302_s23] sm:$0xff]  ;;  %v865_v12 = vld [vmem:[#allocation7 + $0x20] sm:$0xff]  ;;  %v862_v15 = vld [vmem:[#allocation7 + $0x8] sm:$0xff]  ;;  %s628_s23 = sshll.u32 %s625_s11, 4  ;;  %s629_s23 = int_to_ptr.hbm [resolvable:$true] %s628_s23 }
  0x3e   : > { %428 = vmatpush.bf16.msra.mxu0 %v859_v1  ;;  %v864_v13 = vld [vmem:[#allocation7 + $0x18] sm:$0xff]  ;;  %v863_v14 = vld [vmem:[#allocation7 + $0x10] sm:$0xff]  ;;  %v861_v16 = vld [vmem:[#allocation7] sm:$0xff]  ;;  %s1104_s12 = sshra.s32 %s629_s23, 4  ;;  %s1105_s12 = int_to_ptr.hbm [resolvable:$true] %s1104_s12 }
  0x3f   : > { %513 = vmatpush.bf16.msra.mxu1 %v867_v3  ;;  %v876_v17 = vld [vmem:[#allocation8 + $0x38] sm:$0xff]  ;;  %v875_v18 = vld [vmem:[#allocation8 + $0x30] sm:$0xff]  ;;  %v874_v19 = vld [vmem:[#allocation8 + $0x28] sm:$0xff]  ;;  %s1106_s28 = scalar_lea.hbm %s1105_s12, 16  ;;  %p1111_p7 = scmp.lt.s32.totalorder %s1105_s12, %s1398_s7 }
  0x40   : > { %597 = vmatpush.bf16.msra.mxu2 %v876_v17  ;;  %v959_v21 = vld [vmem:[%s1393_s2] ss:$0 sm:$0xff]  ;;  %v873_v28 = vld [vmem:[#allocation8 + $0x20] sm:$0xff]  ;;  %v872_v29 = vld [vmem:[#allocation8 + $0x18] sm:$0xff]  ;;  %p1107_p1 = scmp.ne.s32.totalorder %s1105_s12, %s1106_s28  ;;  %p1112_p2 = scmp.lt.s32.totalorder %s1110_s14, %s1106_s28 }
  0x41   : > { %v871_v30 = vld [vmem:[#allocation8 + $0x10] sm:$0xff]  ;;  %v870_v31 = vld [vmem:[#allocation8 + $0x8] sm:$0xff]  ;;  %v869_v32 = vld [vmem:[#allocation8] sm:$0xff] }
  0x42   : > { %429 = vmatpush.bf16.msra.mxu0 %v858_v4  ;;  %v960_v34 = vld [vmem:[%s1395_s4] ss:$0 sm:$0xff]  ;;  %p1108_p4 = pnand %p1107_p1, %p1303_p0  ;;  %p1113_p9 = por %p1112_p2, %p1111_p7 }
  0x43   : > { %514 = vmatpush.bf16.msra.mxu1 %v866_v5  ;;  %v961_v41 = vld [vmem:[%s1397_s6] ss:$0 sm:$0xff] }
  0x44   : > { %598 = vmatpush.bf16.msra.mxu2 %v875_v18  ;;  %p1109_p8 = pneg %p1108_p4 }
  0x46   : > { %430 = vmatpush.bf16.msra.mxu0 %v857_v6  ;;  %p1114_p10 = pnand %p1113_p9, %p1109_p8 }
  0x47   : > { %515 = vmatpush.bf16.msra.mxu1 %v865_v12 }
  0x48   : > { %599 = vmatpush.bf16.msra.mxu2 %v874_v19 }
  0x4a   : > { %431 = vmatpush.bf16.msra.mxu0 %v856_v7 }
  0x4b   : > { %516 = vmatpush.bf16.msra.mxu1 %v864_v13 }
  0x4c   : > { %600 = vmatpush.bf16.msra.mxu2 %v873_v28 }
  0x4e   : > { %432 = vmatpush.bf16.msra.mxu0 %v855_v8 }
  0x4f   : > { %517 = vmatpush.bf16.msra.mxu1 %v863_v14 }
  0x50   : > { %601 = vmatpush.bf16.msra.mxu2 %v872_v29 }
  0x52   : > { %433 = vmatpush.bf16.msra.mxu0 %v854_v9 }
  0x53   : > { %518 = vmatpush.bf16.msra.mxu1 %v862_v15 }
  0x54   : > { %602 = vmatpush.bf16.msra.mxu2 %v871_v30 }
  0x56   : > { %434 = vmatpush.bf16.msra.mxu0 %v853_v10 }
  0x57   : > { %519 = vmatpush.bf16.msra.mxu1 %v861_v16 }
  0x58   : > { %603 = vmatpush.bf16.msra.mxu2 %v870_v31 }
  0x59   : > { %435 = vmatmul.bf16.vlgmr.msra.gmra.mxu0 %v852_v11 }
  0x5c   : > { %604 = vmatpush.bf16.msra.mxu2 %v869_v32 }
  0xd6   : > { %v436_v20 = vpop.f32.mrf.mxu0 }
  0xd7   : > { %v437_v22 = vadd.f32 %v959_v21, %v436_v20 }
  0xd9   : > { %962 = vtanh.f32 %v437_v22 }
  0xde   : > { %v438_v23 = vpop.f32.mrf.mxu0 }
  0xdf   : > { %v439_v24 = vadd.f32 %v959_v21, %v438_v23  ;;  %v963_v25 = vpop.eup %962 }
  0xe1   : > { %964 = vtanh.f32 %v439_v24 }
  0xe7   : > { %v965_v26 = vpop.eup %964 }
  0xe8   : > { %v443_v27 = vpack.c.bf16 %v965_v26, %v963_v25 }
  0xea   : > { %520 = vmatmul.bf16.vlgmr.msra.gmra.mxu1 %v443_v27 }
 0x167   : > { %v521_v33 = vpop.f32.mrf.mxu1 }
 0x168   : > { %v522_v35 = vadd.f32 %v960_v34, %v521_v33 }
 0x16a   : > { %966 = vtanh.f32 %v522_v35 }
 0x16f   : > { %v523_v36 = vpop.f32.mrf.mxu1 }
 0x170   : > { %v524_v37 = vadd.f32 %v960_v34, %v523_v36  ;;  %v967_v38 = vpop.eup %966 }
 0x172   : > { %968 = vtanh.f32 %v524_v37 }
 0x178   : > { %v969_v39 = vpop.eup %968 }
 0x179   : > { %v528_v40 = vpack.c.bf16 %v969_v39, %v967_v38 }
 0x17b   : > { %605 = vmatmul.bf16.vlgmr.msra.gmra.mxu2 %v528_v40 }
 0x1fe   : > { %v606_v42 = vpop.f32.mrf.mxu2 }
 0x1ff   : > { %v607_v43 = vadd.f32 %v961_v41, %v606_v42 }
 0x201   : > { %611 = vst [vmem:[%s348_s20] sm:$0xff] %v607_v43 }
 0x206   : > { %v608_v44 = vpop.f32.mrf.mxu2 }
 0x207   : > { %v609_v45 = vadd.f32 %v961_v41, %v608_v44 }
 0x209   : > { %612 = vst [vmem:[%s348_s20 + $0x8] sm:$0xff] %v609_v45 }
 0x20a   : > { %1117 = shalt.err (!%p1114_p10)
}
 0x20b   : > { %s1171_s15 = smov 128   ;;  %s1172_s29 = smov 8  }
 0x20c   : > { %892 = dma.vmem_to_hbm [thread:$0]  (%p1303_p0), %s627_s1, 256, %s629_s23, %s614_s30, %s1171_s15, %s1171_s15, %s1172_s29  }
 0x20d PF: > { %p919_p11 = scmp.ge.s32.totalorder %s1164_s27, 2  ;;  %s643_s9 = sand.u32 1, %s1152_s24  }
 0x20e   : > { %s644_s21 = scalar_lea.sflag [#allocation4], %s643_s9 }
 0x20f   : > { %p909_p12 = pnand %p919_p11, %p1248_p6 }
 0x211   : > { %p910_p13 = pneg %p909_p12 }
 0x213   : > { %1147 = dma.done.wait (%p910_p13), %s644_s21, 256  }
 0x214   : > { %1149 = vsyncadd (%p910_p13), %s644_s21, 4294967040  ;;  %p22_p3 = scmp.ge.s32.totalorder %s1285_s13, 5   ;;  %s1411_s24 = smov %s1156_s25 }
 0x215   : > { %s1412_s25 = smov %s1160_s26  ;;  %s1413_s26 = smov %s1299_s17 }
 0x216   : > { %s1414_s27 = smov %s1285_s13  ;;  %24 = sbr.rel (!%p22_p3) target bundleno = 9 (0x9), region = 105 }
 0x21b   :  { %650 = vsyncpa [#allocation3], 1 }
 0x21c   :  { %652 = vsyncpa [#allocation3 + $0x1], 1 }
 0x21d   :  { %653 = vsyncpa [#allocation6], 1 }
 0x21e   :  { %654 = vsyncpa [#allocation9], 1 }
 0x21f   :  { %655 = vsyncpa [#allocation4], 1 }
 0x220   :  { %657 = vsyncpa [#allocation4 + $0x1], 1 }

</bundles_post_ra>
